<compile_context>
chip_gen: v7x
topology: tpu7x:2x2x1
jax: 0.10.0
libtpu: 0.0.40
codegen_flags: <defaults>
</compile_context>

<pallas_src>
import functools

import numpy as np
import jax
import jax.numpy as jnp
from jax.experimental import pallas as pl
from jax.experimental.pallas import tpu as pltpu

LANE = 128        # feature / lane tile (lane-dense stores, MXU-aligned)
NODE_TILE = 128   # node-dim tile (multiple of 128 works on v5e/v6e/v7x)


def _round_up(x, m):
    return ((x + m - 1) // m) * m


# ----------------------------------------------------------------------------
# Pallas kernels
# ----------------------------------------------------------------------------
def _mm_kernel(x_ref, w_ref, b_ref, o_ref, acc_ref, *, add_bias, apply_act):
    """Tiled out = X @ W (+ b) (optional leaky_relu); bf16 in, f32 acc."""
    @pl.when(pl.program_id(2) == 0)
    def _():
        acc_ref[...] = jnp.zeros_like(acc_ref)

    acc_ref[...] += jnp.dot(x_ref[...], w_ref[...],
                            preferred_element_type=jnp.float32)

    @pl.when(pl.program_id(2) == pl.num_programs(2) - 1)
    def _():
        out = acc_ref[...]
        if add_bias:
            out = out + b_ref[...]
        if apply_act:
            out = jnp.where(out > 0, out, 0.01 * out)   # leaky_relu(0.01)
        o_ref[...] = out.astype(o_ref.dtype)


def _agg_kernel(a_ref, dr_ref, dc_ref, h_ref, b_ref, o_ref, acc_ref, *,
                add_bias, apply_act):
    """Tiled out = D^-1/2 (A+I) D^-1/2 @ H (+ b) (optional leaky_relu).

    Normalization fused: A_hat tiles stay exact 0/1 bf16; the column scale
    d_c is applied to the small H k-tile (f32, then bf16 for the MXU) and the
    row scale d_r in the f32 epilogue.
    """
    @pl.when(pl.program_id(2) == 0)
    def _():
        acc_ref[...] = jnp.zeros_like(acc_ref)

    h_scaled = (h_ref[...].astype(jnp.float32) * dc_ref[...]).astype(jnp.bfloat16)
    acc_ref[...] += jnp.dot(a_ref[...], h_scaled,
                            preferred_element_type=jnp.float32)

    @pl.when(pl.program_id(2) == pl.num_programs(2) - 1)
    def _():
        out = acc_ref[...] * dr_ref[...]
        if add_bias:
            out = out + b_ref[...]
        if apply_act:
            out = jnp.where(out > 0, out, 0.01 * out)
        o_ref[...] = out.astype(o_ref.dtype)


def _segment_mean_kernel(oh_t_ref, x_ref, o_ref):
    """o[c] = mean over rows of x with segment c; one-hot arrives pre-transposed [C, N]."""
    seg_sum = jnp.dot(oh_t_ref[...], x_ref[...],
                      preferred_element_type=jnp.float32)            # [C, D]
    counts = jnp.sum(oh_t_ref[...].astype(jnp.float32), axis=1, keepdims=True)
    o_ref[...] = (seg_sum / jnp.maximum(counts, 1.0)).astype(o_ref.dtype)


# ----------------------------------------------------------------------------
# Pallas wrappers
# ----------------------------------------------------------------------------
_DIMSEM = pltpu.CompilerParams(
    dimension_semantics=("parallel", "parallel", "arbitrary"))


def matmul_bias_act(x, w, bias, *, apply_act, out_dtype,
                    tm=NODE_TILE, tn=LANE, tk=LANE):
    m, k = x.shape
    _, n = w.shape
    add_bias = bias is not None
    if bias is None:
        bias = jnp.zeros((1, n), jnp.float32)
    kernel = functools.partial(_mm_kernel, add_bias=add_bias, apply_act=apply_act)
    return pl.pallas_call(
        kernel,
        out_shape=jax.ShapeDtypeStruct((m, n), out_dtype),
        grid=(m // tm, n // tn, k // tk),
        in_specs=[
            pl.BlockSpec((tm, tk), lambda i, j, kk: (i, kk)),
            pl.BlockSpec((tk, tn), lambda i, j, kk: (kk, j)),
            pl.BlockSpec((1, tn), lambda i, j, kk: (0, j)),
        ],
        out_specs=pl.BlockSpec((tm, tn), lambda i, j, kk: (i, j)),
        scratch_shapes=[pltpu.VMEM((tm, tn), jnp.float32)],
        compiler_params=_DIMSEM,
    )(x.astype(jnp.bfloat16), w.astype(jnp.bfloat16), bias.astype(jnp.float32))


def gcn_aggregate(a_hat, d_inv_sqrt, h, bias, *, apply_act, out_dtype,
                  tm=NODE_TILE, tn=LANE, tk=NODE_TILE):
    m, k = a_hat.shape
    _, n = h.shape
    add_bias = bias is not None
    if bias is None:
        bias = jnp.zeros((1, n), jnp.float32)
    kernel = functools.partial(_agg_kernel, add_bias=add_bias, apply_act=apply_act)
    return pl.pallas_call(
        kernel,
        out_shape=jax.ShapeDtypeStruct((m, n), out_dtype),
        grid=(m // tm, n // tn, k // tk),
        in_specs=[
            pl.BlockSpec((tm, tk), lambda i, j, kk: (i, kk)),   # A_hat tile (bf16 0/1)
            pl.BlockSpec((tm, 1), lambda i, j, kk: (i, 0)),     # d_inv_sqrt rows
            pl.BlockSpec((tk, 1), lambda i, j, kk: (kk, 0)),    # d_inv_sqrt cols (k)
            pl.BlockSpec((tk, tn), lambda i, j, kk: (kk, j)),   # H tile
            pl.BlockSpec((1, tn), lambda i, j, kk: (0, j)),     # bias
        ],
        out_specs=pl.BlockSpec((tm, tn), lambda i, j, kk: (i, j)),
        scratch_shapes=[pltpu.VMEM((tm, tn), jnp.float32)],
        compiler_params=_DIMSEM,
    )(a_hat.astype(jnp.bfloat16), d_inv_sqrt, d_inv_sqrt,
      h.astype(jnp.bfloat16), bias.astype(jnp.float32))


def gcn_conv(a_hat, d_inv_sqrt, x, w, b, *, apply_act):
    """One GCNConv: out = A_norm @ X @ W + b, matmul ordering chosen per layer."""
    d_in, d_out = x.shape[1], w.shape[1]
    if d_in < d_out:
        # (A_norm @ X) @ W -- cheaper N^2 term when d_in < d_out.
        m = gcn_aggregate(a_hat, d_inv_sqrt, x, None,
                          apply_act=False, out_dtype=jnp.bfloat16)
        return matmul_bias_act(m, w, b, apply_act=apply_act, out_dtype=jnp.float32)
    # A_norm @ (X @ W) -- cheaper when d_out <= d_in; H computed once.
    h = matmul_bias_act(x, w, None, apply_act=False, out_dtype=jnp.bfloat16)
    return gcn_aggregate(a_hat, d_inv_sqrt, h, b,
                         apply_act=apply_act, out_dtype=jnp.float32)


def segment_mean(x_pad, seg_ids, num_segments_pad):
    """Mean of x rows per segment; rows with seg_id < 0 (padding) are ignored."""
    n_pad, d_pad = x_pad.shape
    # one-hot built already transposed [C, N] (no in-kernel XLU transpose).
    oh_t = (jnp.arange(num_segments_pad, dtype=jnp.int32)[:, None]
            == seg_ids[None, :]).astype(jnp.bfloat16)
    return pl.pallas_call(
        _segment_mean_kernel,
        out_shape=jax.ShapeDtypeStruct((num_segments_pad, d_pad), jnp.float32),
        grid=(1,),
        in_specs=[
            pl.BlockSpec((num_segments_pad, n_pad), lambda i: (0, 0)),
            pl.BlockSpec((n_pad, d_pad), lambda i: (0, 0)),
        ],
        out_specs=pl.BlockSpec((num_segments_pad, d_pad), lambda i: (0, 0)),
    )(oh_t, x_pad.astype(jnp.bfloat16))


# ----------------------------------------------------------------------------
# Glue (graph restructuring, normalization vectors, parameter setup)
# ----------------------------------------------------------------------------
def gcn_normalization(adj_pad, n_real):
    """A_hat = A + I (real nodes only) and the D^-1/2 vector (scaling is fused in-kernel)."""
    n_pad = adj_pad.shape[0]
    self_loops = (jnp.arange(n_pad) < n_real).astype(jnp.float32)
    a_hat = adj_pad + jnp.diag(self_loops)
    deg = jnp.sum(a_hat, axis=1)
    d_inv_sqrt = jnp.where(deg > 0, jax.lax.rsqrt(jnp.maximum(deg, 1e-12)), 0.0)
    return a_hat, d_inv_sqrt.reshape(n_pad, 1).astype(jnp.float32)


def cluster_and_pool(x_pad, adj_pad, batch_np, coord_np, cluster_size, n_real):
    """Identity-labels branch of ClusterGNN.cluster_and_pool (cluster_size >= graph size)."""
    num_graphs = int(batch_np.max()) + 1
    n_pad = adj_pad.shape[0]

    labels = np.empty(n_real, dtype=np.int32)
    new_coord_chunks = []
    total_clusters = 0
    for g in range(num_graphs):
        idx = np.nonzero(batch_np == g)[0]
        n_g = idx.shape[0]
        cur = min(cluster_size, n_g)
        if cur != n_g:
            # TODO(synk): sklearn KMeans branch (data-dependent, CPU) not implemented.
            raise NotImplementedError("KMeans clustering branch not supported")
        labels[idx] = np.arange(n_g, dtype=np.int32) + total_clusters
        new_coord_chunks.append(coord_np[idx])
        total_clusters += cur
    new_coords = np.concatenate(new_coord_chunks, axis=0)

    # new node features: per-cluster mean of member features (Pallas kernel).
    seg_ids = np.full(n_pad, -1, dtype=np.int32)
    seg_ids[:n_real] = labels
    new_x = segment_mean(x_pad, jnp.asarray(seg_ids), n_pad)

    # edge remap + remove self loops + coalesce.  In the identity branch the
    # label map is a permutation of the real nodes, so the dense remap
    # (m.T @ A @ m) reduces to a row/col gather.
    inv = np.argsort(labels).astype(np.int32)               # inv[c] = node with label c
    perm = jnp.asarray(
        np.concatenate([inv, np.arange(n_real, n_pad, dtype=np.int32)]))
    a_new = jnp.take(jnp.take(adj_pad, perm, axis=0), perm, axis=1)
    a_new = (a_new > 0).astype(jnp.float32)                 # coalesce / dedupe
    a_new = a_new * (1.0 - jnp.eye(n_pad, dtype=jnp.float32))  # remove self loops

    # new batch assignment: batch of the first node mapped to each cluster.
    new_batch = np.full(total_clusters, -1, dtype=np.int32)
    new_batch[labels[::-1]] = batch_np[::-1]

    return new_x, a_new, new_batch, new_coords, total_clusters


def init_params(input_dim, hid_dim, num_layers, key):
    """Glorot-uniform W ([in,out], zero-padded to lane multiples), zero bias."""
    params = []
    dims = [input_dim] + [hid_dim] * num_layers
    for i in range(num_layers):
        key, kw = jax.random.split(key)
        fan_in, fan_out = dims[i], dims[i + 1]
        scale = float(np.sqrt(6.0 / (fan_in + fan_out)))
        w_real = jax.random.uniform(kw, (fan_in, fan_out), jnp.float32,
                                    minval=-scale, maxval=scale)
        fi_pad, fo_pad = _round_up(fan_in, LANE), _round_up(fan_out, LANE)
        w = jnp.zeros((fi_pad, fo_pad), jnp.float32).at[:fan_in, :fan_out].set(w_real)
        b = jnp.zeros((1, fo_pad), jnp.float32)
        params.append((w, b))
    return params


def cluster_gnn_forward(x_np, edge_index_np, batch_np, coord_np, params,
                        cluster_sizes, hid_dim):
    n_real, in_dim = x_np.shape
    num_graphs = int(batch_np.max()) + 1
    n_pad = _round_up(max(n_real, NODE_TILE), NODE_TILE)
    f_pad = _round_up(in_dim, LANE)

    x = jnp.zeros((n_pad, f_pad), jnp.float32)
    x = x.at[:n_real, :in_dim].set(jnp.asarray(x_np, jnp.float32))
    # dense adjacency A[dst, src] = 1 for each directed edge (padded, no self loops).
    adj = jnp.zeros((n_pad, n_pad), jnp.float32)
    adj = adj.at[edge_index_np[1], edge_index_np[0]].set(1.0)

    cluster_coords = [np.asarray(coord_np)]
    batch = np.asarray(batch_np, dtype=np.int32)
    for i in range(len(params) - 1):
        w, b = params[i]
        a_hat, d = gcn_normalization(adj, n_real)
        x = gcn_conv(a_hat, d, x, w, b, apply_act=True)
        # F.dropout: eval-mode identity.
        # TODO(synk): training-mode random dropout not implemented.
        if i < len(cluster_sizes):
            x, adj, batch, new_coords, n_real = cluster_and_pool(
                x, adj, batch, cluster_coords[i], cluster_sizes[i], n_real)
            cluster_coords.append(new_coords)

    w, b = params[-1]
    a_hat, d = gcn_normalization(adj, n_real)
    node_emb = gcn_conv(a_hat, d, x, w, b, apply_act=False)

    # global_mean_pool(node_emb, batch)
    g_pad = _round_up(max(num_graphs, 8), 8)
    seg_ids = np.full(n_pad, -1, dtype=np.int32)
    seg_ids[:n_real] = batch
    graph_emb_pad = segment_mean(node_emb, jnp.asarray(seg_ids), g_pad)
    return graph_emb_pad[:num_graphs, :hid_dim]


# ----------------------------------------------------------------------------
# Pure NumPy (f64, unpadded) reference of the module semantics for validation
# ----------------------------------------------------------------------------
def reference_forward(x_np, edge_index_np, batch_np, coord_np, params,
                      cluster_sizes, input_dim, hid_dim):
    dims = [input_dim] + [hid_dim] * len(params)
    params_real = [(np.asarray(w)[:dims[i], :dims[i + 1]].astype(np.float64),
                    np.asarray(b)[0, :dims[i + 1]].astype(np.float64))
                   for i, (w, b) in enumerate(params)]
    x = np.asarray(x_np, np.float64)
    n = x.shape[0]
    num_graphs = int(batch_np.max()) + 1
    adj = np.zeros((n, n))
    adj[edge_index_np[1], edge_index_np[0]] = 1.0
    batch = np.asarray(batch_np)
    coords = [np.asarray(coord_np)]

    def layer(x, adj, w, b, act):
        a_hat = adj + np.eye(adj.shape[0])
        dinv = 1.0 / np.sqrt(a_hat.sum(1))
        out = (dinv[:, None] * a_hat * dinv[None, :]) @ (x @ w) + b
        return np.where(out > 0, out, 0.01 * out) if act else out

    for i in range(len(params_real) - 1):
        w, b = params_real[i]
        x = layer(x, adj, w, b, True)
        labels = np.empty(x.shape[0], dtype=np.int64)
        total, chunks = 0, []
        for g in range(num_graphs):
            idx = np.nonzero(batch == g)[0]
            labels[idx] = np.arange(idx.size) + total
            total += idx.size
            chunks.append(coords[i][idx])
        coords.append(np.concatenate(chunks, axis=0))
        new_x = np.stack([x[labels == c].mean(0) for c in range(total)])
        inv = np.argsort(labels)
        new_adj = (adj[inv][:, inv] > 0).astype(np.float64)
        np.fill_diagonal(new_adj, 0.0)
        new_batch = np.array([batch[labels == c][0] for c in range(total)])
        x, adj, batch = new_x, new_adj, new_batch

    w, b = params_real[-1]
    node_emb = layer(x, adj, w, b, False)
    return np.stack([node_emb[batch == g].mean(0) for g in range(num_graphs)])


# ----------------------------------------------------------------------------
# Main
# ----------------------------------------------------------------------------
if __name__ == "__main__":
    key = jax.random.PRNGKey(0)

    # 14 graphs x 10-node rings => 140 real nodes, padded to 256 so the
    # aggregation kernel runs a (2, 1, 2) grid (2 parallel row tiles x
    # 2 reduction steps through the accumulator).  cluster_sizes=[100,50,10]
    # (module default) are all >= 10, so the reference takes the
    # identity-clustering branch everywhere.
    num_graphs = 14
    nodes_per_graph = 10
    n_nodes = num_graphs * nodes_per_graph
    input_dim = 16
    hid_dim = 32
    coord_dim = 2
    cluster_sizes = [100, 50, 10]
    num_layers = len(cluster_sizes) + 1

    kx, kc, kp = jax.random.split(key, 3)
    x = np.asarray(jax.random.normal(kx, (n_nodes, input_dim), jnp.float32))
    coord = np.asarray(jax.random.normal(kc, (n_nodes, coord_dim), jnp.float32))
    batch_np = np.repeat(np.arange(num_graphs, dtype=np.int32), nodes_per_graph)

    # directed edge list (both directions of each ring edge)
    src, dst = [], []
    for g in range(num_graphs):
        off = g * nodes_per_graph
        for i in range(nodes_per_graph):
            a, b = off + i, off + (i + 1) % nodes_per_graph
            src += [a, b]
            dst += [b, a]
    edge_index = np.stack([np.asarray(src), np.asarray(dst)]).astype(np.int32)

    params = init_params(input_dim, hid_dim, num_layers, kp)

    graph_emb = cluster_gnn_forward(
        x, edge_index, batch_np, coord, params, cluster_sizes, hid_dim)
    graph_emb = np.asarray(jax.block_until_ready(graph_emb))

    assert graph_emb.shape == (num_graphs, hid_dim)
    assert np.all(np.isfinite(graph_emb))

    ref = reference_forward(x, edge_index, batch_np, coord, params,
                            cluster_sizes, input_dim, hid_dim)
    max_err = float(np.max(np.abs(graph_emb - ref)))
    # loose tolerance: bf16 MXU inputs (f32 accumulation) across 4 layers.
    assert max_err < 5e-2, f"max |pallas - reference| = {max_err}"

    print("KERNEL_OK")
</pallas_src>

<mosaic_0001>
module attributes {stable_mosaic.version = 11 : i64} {
  func.func @_mm_kernel(%arg0: i32, %arg1: i32, %arg2: i32, %arg3: memref<128x128xbf16, #tpu.memory_space<vmem>>, %arg4: memref<128x128xbf16, #tpu.memory_space<vmem>>, %arg5: memref<1x128xf32, #tpu.memory_space<vmem>>, %arg6: memref<128x128xbf16, #tpu.memory_space<vmem>>, %arg7: memref<128x128xf32, #tpu.memory_space<vmem>>) attributes {dimension_semantics = [#tpu.dimension_semantics<parallel>, #tpu.dimension_semantics<parallel>, #tpu.dimension_semantics<arbitrary>], iteration_bounds = array<i64: 2, 1, 1>, scalar_prefetch = 0 : i64, scratch_operands = 1 : i64, tpu.core_type = #tpu.core_type<tc>, window_params = [{transform_indices = @transform_0, window_bounds = array<i64: 128, 128>}, {transform_indices = @transform_1, window_bounds = array<i64: 128, 128>}, {transform_indices = @transform_2, window_bounds = array<i64: 1, 128>}, {transform_indices = @transform_3, window_bounds = array<i64: 128, 128>}]} {
    %c0_i32 = arith.constant 0 : i32
    %0 = arith.cmpi eq, %arg2, %c0_i32 : i32
    %1 = arith.extui %0 : i1 to i32
    %c0_i32_0 = arith.constant 0 : i32
    %2 = arith.cmpi ne, %1, %c0_i32_0 : i32
    scf.if %2 {
      %cst_10 = arith.constant 0.000000e+00 : f32
      %12 = vector.broadcast %cst_10 : f32 to vector<128x128xf32>
      %c0_11 = arith.constant 0 : index
      %c0_12 = arith.constant 0 : index
      %13 = vector.load %arg7[%c0_11, %c0_12] : memref<128x128xf32, #tpu.memory_space<vmem>>, vector<128x128xf32>
      tpu.vector_store %arg7[%c0_11, %c0_12], %12 {strides = array<i32>} : memref<128x128xf32, #tpu.memory_space<vmem>>, vector<128x128xf32>,
    } else {
    }
    %c0 = arith.constant 0 : index
    %c0_1 = arith.constant 0 : index
    %3 = vector.load %arg7[%c0, %c0_1] : memref<128x128xf32, #tpu.memory_space<vmem>>, vector<128x128xf32>
    %c0_2 = arith.constant 0 : index
    %c0_3 = arith.constant 0 : index
    %4 = vector.load %arg3[%c0_2, %c0_3] : memref<128x128xbf16, #tpu.memory_space<vmem>>, vector<128x128xbf16>
    %c0_4 = arith.constant 0 : index
    %c0_5 = arith.constant 0 : index
    %5 = vector.load %arg4[%c0_4, %c0_5] : memref<128x128xbf16, #tpu.memory_space<vmem>>, vector<128x128xbf16>
    %cst = arith.constant dense<0.000000e+00> : vector<128x128xf32>
    %6 = tpu.matmul %4, %5, %cst {dimension_numbers = #tpu.dot_dimension_numbers<[1], [0], [0], [1], [0, 0, 1, 1], [], []>} : vector<128x128xbf16>, vector<128x128xbf16>, vector<128x128xf32> -> vector<128x128xf32>
    %7 = arith.addf %3, %6 : vector<128x128xf32>
    %c0_6 = arith.constant 0 : index
    %c0_7 = arith.constant 0 : index
    %8 = vector.load %arg7[%c0_6, %c0_7] : memref<128x128xf32, #tpu.memory_space<vmem>>, vector<128x128xf32>
    tpu.vector_store %arg7[%c0_6, %c0_7], %7 {strides = array<i32>} : memref<128x128xf32, #tpu.memory_space<vmem>>, vector<128x128xf32>,
    %c0_i32_8 = arith.constant 0 : i32
    %9 = arith.cmpi eq, %arg2, %c0_i32_8 : i32
    %10 = arith.extui %9 : i1 to i32
    %c0_i32_9 = arith.constant 0 : i32
    %11 = arith.cmpi ne, %10, %c0_i32_9 : i32
    scf.if %11 {
      %c0_10 = arith.constant 0 : index
      %c0_11 = arith.constant 0 : index
      %12 = vector.load %arg7[%c0_10, %c0_11] : memref<128x128xf32, #tpu.memory_space<vmem>>, vector<128x128xf32>
      %13 = arith.truncf %12 : vector<128x128xf32> to vector<128x128xbf16>
      %c0_12 = arith.constant 0 : index
      %c0_13 = arith.constant 0 : index
      %14 = vector.load %arg6[%c0_12, %c0_13] : memref<128x128xbf16, #tpu.memory_space<vmem>>, vector<128x128xbf16>
      tpu.vector_store %arg6[%c0_12, %c0_13], %13 {strides = array<i32>} : memref<128x128xbf16, #tpu.memory_space<vmem>>, vector<128x128xbf16>,
    } else {
    }
    return
  }
  func.func @transform_0(%arg0: i32, %arg1: i32, %arg2: i32) -> (i32, i32) {
    %c0_i32 = arith.constant 0 : i32
    return %arg0, %arg2 : i32, i32
  }
  func.func @transform_1(%arg0: i32, %arg1: i32, %arg2: i32) -> (i32, i32) {
    %c0_i32 = arith.constant 0 : i32
    return %arg2, %arg1 : i32, i32
  }
  func.func @transform_2(%arg0: i32, %arg1: i32, %arg2: i32) -> (i32, i32) {
    %c0_i32 = arith.constant 0 : i32
    %c0_i32_0 = arith.constant 0 : i32
    return %c0_i32, %arg1 : i32, i32
  }
  func.func @transform_3(%arg0: i32, %arg1: i32, %arg2: i32) -> (i32, i32) {
    %c0_i32 = arith.constant 0 : i32
    return %arg0, %arg1 : i32, i32
  }
}

</mosaic_0001>

<bundles_post_ra>
// kernel: tpu_custom_call.1
= control target key start
LH: loop header
LB: loop body
LE: loop exit
PB: predicated region body
PF: predicated region fallthrough
CT: control target
= control target key end

     0   :  { %8 = vsyncpa [#allocation4], 0  ;;  %s1462_s0 = inlined_call_operand.hbm [shape: bf16[256,128], index: 0, kind: input, shape index: {}]   ;;  %s1463_s1 = inlined_call_operand.hbm [shape: bf16[128,128], index: 1, kind: input, shape index: {}]   ;;  %s1464_s2 = inlined_call_operand.vmem [shape: f32[1,128], index: 2, kind: input, shape index: {}]   ;;  %s1465_s3 = inlined_call_operand.hbm [shape: bf16[256,128], index: 3, kind: output, shape index: {}]  }
   0x1   :  { %10 = vsyncpa [#allocation4 + $0x1], 0 }
   0x2   :  { %11 = vsyncpa [#allocation7], 0 }
   0x3   :  { %12 = vsyncpa [#allocation5], 0 }
   0x4   :  { %14 = vsyncpa [#allocation5 + $0x1], 0  ;;  %s1223_s12 = smov 0   ;;  %s1225_s13 = smov 0  }
   0x5   :  { %s1227_s14 = smov 0   ;;  %s1229_s15 = smov 0  }
   0x6   :  { %s1231_s16 = smov 0   ;;  %s1233_s17 = smov 0  }
   0x7 LB: > { %s778_s2 = sadd.s32 4294967295, %s1194_s17   ;;  %s779_s18 = sadd.s32 4294967294, %s1194_s17   ;;  %s1194_s17 = sphi %s1233_s17, %s20_s17   ;;  %s1190_s16 = sphi %s1231_s16, %s1489_s16   ;;  %s1186_s15 = sphi %s1229_s15, %s1488_s15   ;;  %s1182_s14 = sphi %s1227_s14, %s1487_s14   ;;  %s1178_s13 = sphi %s1225_s13, %s1486_s13   ;;  %s1174_s12 = sphi %s1223_s12, %s1485_s12  }
   0x8   : > { %p61_p0 = scmp.ne.s32.totalorder %s1178_s13, %s1174_s12  ;;  %p1257_p1 = scmp.eq.s32.totalorder %s778_s2, 0 }
   0x9   : > { %p1261_p2 = scmp.eq.s32.totalorder %s778_s2, 1  ;;  %p147_p3 = scmp.eq.s32.totalorder %s779_s18, 1 }
   0xa   : > { %s1470_s19 = scalar_select %p1257_p1, 1, 0 }
   0xb   : > { %s1471_s20 = scalar_select %p1261_p2, 1, 0 }
   0xc   : > { %p1267_p4 = por %p1257_p1, %p61_p0  ;;  %p780_p5 = scmp.ge.s32.totalorder %s1194_s17, 1 }
   0xd   : > { %p1272_p6 = por %p147_p3, %p61_p0  ;;  %p154_p7 = scmp.lt.s32.totalorder %s1194_s17, 3 }
   0xe   : > { %s1472_s21 = scalar_select %p1267_p4, 1, 0 }
   0xf   : > { %s1473_s22 = scalar_select %p1272_p6, 1, 0 }
  0x10   : > { %p1277_p8 = pnand %p780_p5, %p154_p7  ;;  %s1196_s24 = smov [#allocation6]  }
  0x11   : > { %s170_s25 = sshll.u32 %s1196_s24, 4  ;;  %s39_s27 = sadd.s32 1, %s1190_s16  ;;  %s171_s25 = int_to_ptr.vmem [resolvable:$true] %s170_s25 }
  0x12   : > { %s1474_s23 = scalar_select %p1277_p8, 1, 0 }
  0x13   : > { %p965_p9 = pneg %p1277_p8  ;;  %s1050_s30 = scalar_lea.hbm %s1463_s1, 1024 }
  0x14   : > { %p1051_p12 = scmp.ne.s32.totalorder %s1463_s1, %s1050_s30  ;;  %p1057_p5 = scmp.lt.u32.totalorder %s1050_s30, %s1463_s1 }
  0x15   : > { %p1286_p11 = pnand %p965_p9, %p1257_p1 }
  0x17   : > { %p1052_p13 = pneg %p1286_p11 }
  0x19   : > { %p1053_p0 = pnand %p1052_p13, %p1051_p12 }
  0x1b   : > { %p1054_p3 = pneg %p1053_p0 }
  0x1d   : > { %p1059_p7 = pnand %p1057_p5, %p1054_p3 }
  0x1f   : > { %1062 = shalt.err (!%p1059_p7)
}
  0x20   : > { %s1063_s8 = scalar_lea.vmem %s171_s25, 1024  ;;  %p1071_p1 = scmp.lt.s32.totalorder %s171_s25, %s171_s25 }
  0x21   : > { %p1064_p9 = scmp.ne.s32.totalorder %s171_s25, %s1063_s8  ;;  %p1072_p4 = scmp.lt.s32.totalorder %s1063_s8, %s1063_s8 }
  0x23   : > { %p1066_p10 = pnand %p1064_p9, %p1052_p13  ;;  %p1073_p8 = por %p1072_p4, %p1071_p1 }
  0x25   : > { %p1067_p6 = pneg %p1066_p10 }
  0x27   : > { %p1074_p2 = pnand %p1073_p8, %p1067_p6 }
  0x29   : > { %1077 = shalt.err (!%p1074_p2)
}
  0x2a   : > { %s1197_s9 = smov 64   ;;  %s1198_s10 = smov 4  }
  0x2b   : > { %968 = dma.hbm_to_vmem [thread:$0]  (!%p1286_p11), %s1463_s1, 1024, %s171_s25, [#allocation7], %s1197_s9, %s1197_s9, %s1198_s10  }
  0x2c   : > { %p41_p1 = scmp.ge.s32.totalorder %s39_s27, 2  ;;  %s48_s18 = sadd.s32 1, %s1182_s14 }
  0x2d   : > { %p55_p2 = scmp.ne.s32.totalorder %s1182_s14, %s1178_s13  ;;  %p56_p4 = scmp.eq.s32.totalorder %s1194_s17, 0 }
  0x2e   : > { %s1491_s27 = smov (%p41_p1, %s39_s27), 0  ;;  %p1477_p8 = scmp.ne.s32.totalorder %s1471_s20, 0 }
  0x2f   : > { %p1316_p6 = por %p56_p4, %p55_p2  ;;  %s43_s28 = ssub.s32 %s1190_s16, %s1491_s27 }
  0x30   : > { %p1322_p10 = por %p1477_p8, %p55_p2  ;;  %p978_p12 = scmp.lt.s32.totalorder %s1194_s17, 2 }
  0x31   : > { %p46_p11 = scmp.eq.s32.totalorder %s43_s28, 0  ;;  %s190_s25 = sand.u32 1, %s1182_s14  }
  0x32   : > { %s784_s29 = sshll.u32 %s190_s25, 6  ;;  %s828_s4 = sshll.u32 %s1190_s16, 10 }
  0x33   : > { %s1331_s30 = scalar_select %p46_p11, %s1182_s14, %s48_s18  }
  0x34   : > { %s1337_s7 = scalar_lea.hbm %s1462_s0, %s828_s4  ;;  %s194_s20 = scalar_lea.vmem [#allocation3], %s784_s29 }
  0x35   : > { %s202_s8 = sshll.u32 %s194_s20, 4  ;;  %p1343_p13 = pnand %p978_p12, %p1316_p6  ;;  %s1339_s8 = int_to_ptr.vmem [resolvable:$true] %s202_s8 }
  0x36   : > { %s1347_s2 = scalar_lea.sflag [#allocation4], %s190_s25  ;;  %s1078_s18 = scalar_lea.hbm %s1337_s7, 1024 }
  0x37   : > { %p1079_p0 = scmp.ne.s32.totalorder %s1337_s7, %s1078_s18  ;;  %p1080_p3 = pneg %p1343_p13 }
  0x38   : > { %s1083_s24 = scalar_lea.hbm %s1462_s0, 2048  ;;  %p1084_p9 = scmp.lt.u32.totalorder %s1337_s7, %s1462_s0 }
  0x39   : > { %p1081_p5 = pnand %p1080_p3, %p1079_p0  ;;  %p1085_p1 = scmp.lt.u32.totalorder %s1083_s24, %s1078_s18 }
  0x3a   : > { %p1087_p4 = scmp.lt.u32.totalorder %s1078_s18, %s1337_s7 }
  0x3b   : > { %p1082_p7 = pneg %p1081_p5  ;;  %p1086_p2 = por %p1085_p1, %p1084_p9 }
  0x3d   : > { %p1088_p6 = por %p1087_p4, %p1086_p2 }
  0x3f   : > { %p1089_p8 = pnand %p1088_p6, %p1082_p7 }
  0x41   : > { %1092 = shalt.err (!%p1089_p8)
}
  0x42   : > { %s1093_s25 = scalar_lea.vmem %s1339_s8, 1024  ;;  %s1199_s6 = smov [#allocation3]  }
  0x43   : > { %p1094_p12 = scmp.ne.s32.totalorder %s1339_s8, %s1093_s25  ;;  %s1098_s20 = sshll.u32 %s1199_s6, 4  ;;  %s1099_s20 = int_to_ptr.vmem [resolvable:$false] %s1098_s20 }
  0x44   : > { %s1100_s28 = scalar_lea.vmem %s1099_s20, 2048  ;;  %p1101_p5 = scmp.lt.s32.totalorder %s1339_s8, %s1099_s20 }
  0x45   : > { %p1096_p11 = pnand %p1094_p12, %p1080_p3  ;;  %p1102_p9 = scmp.lt.s32.totalorder %s1100_s28, %s1093_s25 }
  0x47   : > { %p1097_p0 = pneg %p1096_p11  ;;  %p1103_p1 = por %p1102_p9, %p1101_p5 }
  0x49   : > { %p1104_p2 = pnand %p1103_p1, %p1097_p0 }
  0x4b   : > { %1107 = shalt.err (!%p1104_p2)
}
  0x4c   : > { %972 = dma.hbm_to_vmem [thread:$0]  (!%p1343_p13), %s1337_s7, 1024, %s1339_s8, %s1347_s2, %s1197_s9, %s1197_s9, %s1198_s10  }
  0x4d   : > { %p1480_p3 = scmp.ne.s32.totalorder %s1474_s23, 0 }
  0x4e   : > { %s1381_s18 = sand.u32 (!%p1480_p3), 1, %s1178_s13   ;;  %p1481_p7 = scmp.ne.s32.totalorder (!%p1480_p3), %s1472_s21, 0 }
  0x4f   : > { %214 = sbr.rel (%p1480_p3) target bundleno = 363 (0x16b), region = 32  ;;  %s788_s29 = sshll.u32 (!%p1480_p3), %s1381_s18, 6 }
  0x50   : > { %s217_s24 = scalar_lea.sflag (!%p1480_p3), [#allocation4], %s1381_s18  ;;  %s1387_s11 = scalar_lea.vmem (!%p1480_p3), [#allocation3], %s788_s29 }
  0x56   : > { %1161 = dma.done.wait (%p1481_p7), %s217_s24, 1024  }
  0x57   : > { %1163 = vsyncadd (%p1481_p7), %s217_s24, 4294966272  ;;  %p1482_p13 = scmp.ne.s32.totalorder %s1470_s19, 0 }
  0x59   : > { %1165 = dma.done.wait (%p1482_p13), [#allocation7], 1024  }
  0x5a   : > { %1167 = vsyncadd (%p1482_p13), [#allocation7], 4294966272  ;;  %v1034_v0 = vld [vmem:[#allocation6] sm:$0xff]   ;;  %v1035_v1 = vld [vmem:[#allocation6 + $0x8] sm:$0xff]   ;;  %s249_s19 = scalar_lea.vmem [#allocation8], %s788_s29  ;;  %s845_s23 = sshll.u32 %s1186_s15, 10 }
  0x5b   : > { %909 = vmatprep.subr.bf16.mxu0 %v1034_v0  ;;  %941 = vmatprep.subr.bf16.mxu1 %v1034_v0  ;;  %v1036_v2 = vld [vmem:[#allocation6 + $0x10] sm:$0xff]   ;;  %v1037_v3 = vld [vmem:[#allocation6 + $0x18] sm:$0xff]   ;;  %v1042_v4 = vld [vmem:[%s1387_s11] sm:$0xff]   ;;  %s664_s21 = sshll.u32 %s249_s19, 4  ;;  %s1413_s7 = scalar_lea.hbm %s1465_s3, %s845_s23  ;;  %s1408_s21 = int_to_ptr.vmem [resolvable:$true] %s664_s21 }
  0x5c   : > { %910 = vmatpush3.bf16.msra.mxu0 %v1034_v0  ;;  %949 = vmatpush3.bf16.msra.mxu1 %v1034_v0  ;;  %v1043_v5 = vld [vmem:[%s1387_s11 + $0x20] sm:$0xff]   ;;  %v1039_v7 = vld [vmem:[#allocation6 + $0x28] sm:$0xff]   ;;  %v1040_v8 = vld [vmem:[#allocation6 + $0x30] sm:$0xff]   ;;  %s650_s15 = scalar_lea.sflag [#allocation5], %s1381_s18  ;;  %s1108_s8 = scalar_lea.vmem %s1408_s21, 1024 }
  0x5d   : > { %911 = vmatprep.subr.bf16.mxu0 %v1035_v1  ;;  %942 = vmatprep.subr.bf16.mxu1 %v1035_v1  ;;  %v1038_v6 = vld [vmem:[#allocation6 + $0x20] sm:$0xff]   ;;  %v1041_v9 = vld [vmem:[#allocation6 + $0x38] sm:$0xff]   ;;  %v1044_v10 = vld [vmem:[%s1387_s11 + $0x8] sm:$0xff]   ;;  %p1109_p4 = scmp.ne.s32.totalorder %s1408_s21, %s1108_s8  ;;  %s1200_s2 = smov [#allocation8]  }
  0x5e   : > { %925 = vmatprep.mubr.bf16.mxu0 %v1042_v4  ;;  %933 = vmatprep.mubr.bf16.mxu1 %v1043_v5  ;;  %v1045_v11 = vld [vmem:[%s1387_s11 + $0x28] sm:$0xff]   ;;  %v1046_v12 = vld [vmem:[%s1387_s11 + $0x10] sm:$0xff]   ;;  %v1048_v14 = vld [vmem:[%s1387_s11 + $0x18] sm:$0xff]   ;;  %s1112_s4 = sshll.u32 %s1200_s2, 4  ;;  %s1113_s4 = int_to_ptr.vmem [resolvable:$false] %s1112_s4 }
  0x5f   : > { %v1047_v13 = vld [vmem:[%s1387_s11 + $0x30] sm:$0xff]   ;;  %v1049_v15 = vld [vmem:[%s1387_s11 + $0x38] sm:$0xff]   ;;  %p1110_p6 = pnand %p1109_p4, %p1322_p10  ;;  %s1114_s5 = scalar_lea.vmem %s1113_s4, 2048 }
  0x60   : > { %912 = vmatpush3.bf16.msra.mxu0 %v1035_v1  ;;  %950 = vmatpush3.bf16.msra.mxu1 %v1035_v1  ;;  %p1115_p12 = scmp.lt.s32.totalorder %s1408_s21, %s1113_s4  ;;  %p1116_p11 = scmp.lt.s32.totalorder %s1114_s5, %s1108_s8 }
  0x61   : > { %913 = vmatprep.subr.bf16.mxu0 %v1036_v2  ;;  %943 = vmatprep.subr.bf16.mxu1 %v1036_v2  ;;  %p1111_p8 = pneg %p1110_p6 }
  0x62   : > { %p1117_p0 = por %p1116_p11, %p1115_p12 }
  0x64   : > { %914 = vmatpush3.bf16.msra.mxu0 %v1036_v2  ;;  %951 = vmatpush3.bf16.msra.mxu1 %v1036_v2  ;;  %p1118_p5 = pnand %p1117_p0, %p1111_p8 }
  0x65   : > { %915 = vmatprep.subr.bf16.mxu0 %v1037_v3  ;;  %944 = vmatprep.subr.bf16.mxu1 %v1037_v3 }
  0x68   : > { %916 = vmatpush3.bf16.msra.mxu0 %v1037_v3  ;;  %952 = vmatpush3.bf16.msra.mxu1 %v1037_v3 }
  0x69   : > { %917 = vmatprep.subr.bf16.mxu0 %v1038_v6  ;;  %945 = vmatprep.subr.bf16.mxu1 %v1038_v6 }
  0x6c   : > { %918 = vmatpush3.bf16.msra.mxu0 %v1038_v6  ;;  %953 = vmatpush3.bf16.msra.mxu1 %v1038_v6 }
  0x6d   : > { %919 = vmatprep.subr.bf16.mxu0 %v1039_v7  ;;  %946 = vmatprep.subr.bf16.mxu1 %v1039_v7 }
  0x70   : > { %920 = vmatpush3.bf16.msra.mxu0 %v1039_v7  ;;  %954 = vmatpush3.bf16.msra.mxu1 %v1039_v7 }
  0x71   : > { %921 = vmatprep.subr.bf16.mxu0 %v1040_v8  ;;  %947 = vmatprep.subr.bf16.mxu1 %v1040_v8 }
  0x74   : > { %922 = vmatpush3.bf16.msra.mxu0 %v1040_v8  ;;  %955 = vmatpush3.bf16.msra.mxu1 %v1040_v8 }
  0x75   : > { %923 = vmatprep.subr.bf16.mxu0 %v1041_v9  ;;  %948 = vmatprep.subr.bf16.mxu1 %v1041_v9 }
  0x78   : > { %924 = vmatpush3.bf16.msra.mxu0 %v1041_v9  ;;  %956 = vmatpush3.bf16.msra.mxu1 %v1041_v9 }
  0x7b   : > { %926 = vmatmul.mubr.bf16.vlgmr.msra.gmra.mrb[0].mxu0 %v1044_v10  ;;  %934 = vmatmul.mubr.bf16.vlgmr.msra.gmra.mrb[0].mxu1 %v1045_v11 }
  0x7c   : > { %929 = vmatprep.mubr.bf16.mxu0 %v1046_v12  ;;  %937 = vmatprep.mubr.bf16.mxu1 %v1047_v13 }
  0x83   : > { %930 = vmatmul.mubr.bf16.gmra.mrb[4].mxu0 %v1048_v14  ;;  %938 = vmatmul.mubr.bf16.gmra.mrb[4].mxu1 %v1049_v15 }
 0x14e   : > { %v927_v16 = vpop.f32.mrb[0].mxu0  ;;  %v935_v17 = vpop.f32.mrb[0].mxu1 }
 0x14f   : > { %v455_v18 = vpop.f32.mrb[1].mxu0  ;;  %v487_v19 = vpop.f32.mrb[1].mxu1 }
 0x150   : > { %v928_v20 = vpop.f32.mrb[2].mxu0  ;;  %v936_v21 = vpop.f32.mrb[2].mxu1 }
 0x151   : > { %v854_v22 = vpack.c.bf16 %v928_v20, %v927_v16  ;;  %v874_v23 = vpack.c.bf16 %v936_v21, %v935_v17  ;;  %v458_v24 = vpop.f32.mrb[3].mxu0  ;;  %v490_v25 = vpop.f32.mrb[3].mxu1 }
 0x152   : > { %v849_v26 = vpack.c.bf16 %v458_v24, %v455_v18  ;;  %v869_v27 = vpack.c.bf16 %v490_v25, %v487_v19 }
 0x153   : > { %886 = vst [vmem:[%s249_s19 + $0x8] sm:$0xff] %v854_v22   ;;  %890 = vst [vmem:[%s249_s19 + $0x28] sm:$0xff] %v874_v23  }
 0x154   : > { %850 = vst [vmem:[%s249_s19] sm:$0xff] %v849_v26   ;;  %889 = vst [vmem:[%s249_s19 + $0x20] sm:$0xff] %v869_v27  }
 0x156   : > { %v931_v28 = vpop.f32.mrb[4].mxu0  ;;  %v939_v29 = vpop.f32.mrb[4].mxu1 }
 0x157   : > { %v471_v30 = vpop.f32.mrb[5].mxu0  ;;  %v503_v31 = vpop.f32.mrb[5].mxu1 }
 0x158   : > { %v932_v32 = vpop.f32.mrb[6].mxu0  ;;  %v940_v33 = vpop.f32.mrb[6].mxu1 }
 0x159   : > { %v864_v34 = vpack.c.bf16 %v932_v32, %v931_v28  ;;  %v884_v35 = vpack.c.bf16 %v940_v33, %v939_v29  ;;  %v474_v36 = vpop.f32.mrb[7].mxu0  ;;  %v506_v37 = vpop.f32.mrb[7].mxu1 }
 0x15a   : > { %v859_v38 = vpack.c.bf16 %v474_v36, %v471_v30  ;;  %v879_v39 = vpack.c.bf16 %v506_v37, %v503_v31 }
 0x15b   : > { %888 = vst [vmem:[%s249_s19 + $0x18] sm:$0xff] %v864_v34   ;;  %892 = vst [vmem:[%s249_s19 + $0x38] sm:$0xff] %v884_v35  }
 0x15c   : > { %887 = vst [vmem:[%s249_s19 + $0x10] sm:$0xff] %v859_v38   ;;  %891 = vst [vmem:[%s249_s19 + $0x30] sm:$0xff] %v879_v39  }
 0x15d   : > { %1121 = shalt.err (!%p1118_p5)
}
 0x15e   : > { %s1122_s25 = scalar_lea.hbm %s1413_s7, 1024  ;;  %s1126_s28 = scalar_lea.hbm %s1465_s3, 2048 }
 0x15f   : > { %p1123_p9 = scmp.ne.s32.totalorder %s1413_s7, %s1122_s25  ;;  %p1127_p3 = scmp.lt.u32.totalorder %s1413_s7, %s1465_s3 }
 0x160   : > { %p1128_p7 = scmp.lt.u32.totalorder %s1126_s28, %s1122_s25  ;;  %p1130_p4 = scmp.lt.u32.totalorder %s1122_s25, %s1413_s7 }
 0x161   : > { %p1124_p1 = pnand %p1123_p9, %p1322_p10 }
 0x162   : > { %p1129_p13 = por %p1128_p7, %p1127_p3 }
 0x163   : > { %p1125_p2 = pneg %p1124_p1 }
 0x164   : > { %p1131_p6 = por %p1130_p4, %p1129_p13 }
 0x166   : > { %p1132_p8 = pnand %p1131_p6, %p1125_p2 }
 0x168   : > { %1135 = shalt.err (!%p1132_p8)
}
 0x169   : > { %s1201_s11 = smov 64   ;;  %s1202_s19 = smov 4  }
 0x16a   : > { %963 = dma.vmem_to_hbm [thread:$0]  (%p1322_p10), %s1408_s21, 1024, %s1413_s7, %s650_s15, %s1201_s11, %s1201_s11, %s1202_s19  }
 0x16b PF: > { %s679_s23 = sand.u32 1, %s1174_s12   ;;  %p1483_p12 = scmp.ne.s32.totalorder %s1473_s22, 0 }
 0x16c   : > { %p1484_p11 = scmp.ge.s32.totalorder %s1194_s17, 2  ;;  %s680_s9 = scalar_lea.sflag [#allocation5], %s679_s23 }
 0x16e   : > { %p974_p0 = pnand %p1484_p11, %p1483_p12 }
 0x170   : > { %1169 = dma.done.wait (!%p974_p0), %s680_s9, 1024  }
 0x171   : > { %1171 = vsyncadd (!%p974_p0), %s680_s9, 4294966272  ;;  %s20_s17 = sadd.s32 1, %s1194_s17   ;;  %s1485_s12 = smov %s1178_s13 }
 0x172   : > { %p17_p5 = scmp.ge.s32.totalorder %s20_s17, 4   ;;  %s1486_s13 = smov %s1182_s14 }
 0x173   : > { %s1487_s14 = smov %s1331_s30  ;;  %s1488_s15 = smov %s1190_s16 }
 0x174   : > { %s1489_s16 = smov %s1491_s27  ;;  %19 = sbr.rel (!%p17_p5) target bundleno = 7 (0x7), region = 93 }
 0x17b   :  { %685 = vsyncpa [#allocation4], 1 }
 0x17c   :  { %687 = vsyncpa [#allocation4 + $0x1], 1 }
 0x17d   :  { %688 = vsyncpa [#allocation7], 1 }
 0x17e   :  { %689 = vsyncpa [#allocation5], 1 }
 0x17f   :  { %691 = vsyncpa [#allocation5 + $0x1], 1 }

</bundles_post_ra>
